<compile_context>
chip_gen: v6e
topology: v6e:2x2x1
jax: 0.10.0
libtpu: 0.0.40
codegen_flags: <defaults>
</compile_context>

<pallas_src>
import functools
import math

import jax
import jax.numpy as jnp
import numpy as np
from jax import lax
from jax.experimental import pallas as pl
from jax.experimental.pallas import tpu as pltpu

LN_EPS = 1e-5
NEG_INF = -1e30      # causal-mask sentinel; scores stay f32 so this is safe


def _layernorm(x, w, b):
    mu = jnp.mean(x, axis=-1, keepdims=True)
    var = jnp.mean((x - mu) ** 2, axis=-1, keepdims=True)
    return (x - mu) * lax.rsqrt(var + LN_EPS) * w + b


def _gelu_exact(x):
    # torch.nn.GELU() default (exact erf form), kept in f32
    return 0.5 * x * (1.0 + lax.erf(x * (1.0 / math.sqrt(2.0))))


# --------------------------- kernel 1: LN1 + fused QKV ---------------------------
def qkv_kernel(x_ref, ln1_w_ref, ln1_b_ref, w_qkv_ref, b_qkv_ref, qkv_ref, *,
               matmul_dtype):
    h = _layernorm(x_ref[...], ln1_w_ref[...], ln1_b_ref[...])          # (tq, C) f32
    # Single wide matmul: N = 3C fills the 256-wide MXU (vs. three hs-wide ones).
    qkv = jnp.dot(h.astype(matmul_dtype), w_qkv_ref[...],
                  preferred_element_type=jnp.float32) + b_qkv_ref[...]  # (tq, 3C) f32
    qkv_ref[...] = qkv.astype(qkv_ref.dtype)                            # lane-dense store


# ----------------- kernel 2: flash attention + out-proj + MLP --------------------
def attn_mlp_kernel(x_ref, q_ref, k_ref, v_ref,
                    wo_ref, bo_ref, ln2_w_ref, ln2_b_ref,
                    w_fc_ref, b_fc_ref, w_pr_ref, b_pr_ref,
                    o_ref,
                    m_sc, l_sc, acc_sc,
                    *, tk, matmul_dtype):
    cd = matmul_dtype
    f32 = jnp.float32
    H, tq, hs = q_ref.shape
    C = x_ref.shape[-1]
    qi = pl.program_id(1)

    q = q_ref[...]                                   # (H, tq, hs), already `cd`

    # online-softmax running max / denominator / weighted-V accumulators
    m_sc[...] = jnp.full(m_sc.shape, NEG_INF, f32)
    l_sc[...] = jnp.zeros(l_sc.shape, f32)
    acc_sc[...] = jnp.zeros(acc_sc.shape, f32)

    row = qi * tq + lax.broadcasted_iota(jnp.int32, (tq, tk), 0)        # global q rows

    # causal tile skipping: only KV tiles whose start is <= last query row
    n_kv = ((qi + 1) * tq + tk - 1) // tk

    def kv_step(j, carry):
        start = pl.multiple_of(j * tk, tk)
        k_t = k_ref[:, pl.ds(start, tk), :]                             # (H, tk, hs)
        v_t = v_ref[:, pl.ds(start, tk), :]
        # scores: 1/sqrt(hs) already folded into q.  f32 accumulate; mask/softmax
        # stay f32 (the -1e30 sentinel is not bf16-safe).
        s = jnp.einsum('htd,hsd->hts', q, k_t,
                       preferred_element_type=f32)                      # (H, tq, tk)
        col = start + lax.broadcasted_iota(jnp.int32, (tq, tk), 1)
        s = jnp.where((row >= col)[None], s, NEG_INF)

        m_prev = m_sc[...]
        m_new = jnp.maximum(m_prev, jnp.max(s, axis=-1, keepdims=True))
        alpha = jnp.exp(m_prev - m_new)
        p = jnp.exp(s - m_new)                                          # unnormalized
        l_sc[...] = alpha * l_sc[...] + jnp.sum(p, axis=-1, keepdims=True)
        acc_sc[...] = alpha * acc_sc[...] + jnp.einsum(
            'hts,hsd->htd', p.astype(cd), v_t, preferred_element_type=f32)
        m_sc[...] = m_new
        return carry

    lax.fori_loop(0, n_kv, kv_step, 0)

    # l > 0 is guaranteed: the causal diagonal is always unmasked for every row.
    l = l_sc[...]
    if jnp.dtype(cd) == jnp.dtype(jnp.float32):
        y = acc_sc[...] / l                       # exact divide for the f32 check path
    else:
        y = acc_sc[...] * pl.reciprocal(l, approx=True)   # EUP slot, off the VPU path

    # output projection with the head reduction fused in:
    #   attn = concat_h(y[h]) @ Wproj == sum_h y[h] @ Wo[h]
    # accumulated into a single (tq, C) f32 tile -> no (H, tq, C) intermediate.
    attn = jnp.zeros((tq, C), f32) + bo_ref[...]
    for h in range(H):        # static unroll; each is a lane-dense (tq,hs)@(hs,C) matmul
        attn = attn + jnp.dot(y[h].astype(cd), wo_ref[h],
                              preferred_element_type=f32)

    x1 = x_ref[...] + attn                                              # residual 1

    h2 = _layernorm(x1, ln2_w_ref[...], ln2_b_ref[...])
    ff = jnp.dot(h2.astype(cd), w_fc_ref[...],
                 preferred_element_type=f32) + b_fc_ref[...]            # (tq, 4C)
    ff = _gelu_exact(ff)
    ff = jnp.dot(ff.astype(cd), w_pr_ref[...],
                 preferred_element_type=f32) + b_pr_ref[...]            # (tq, C)

    o_ref[...] = x1 + ff                                                # residual 2


# --------------------------------- wrapper ---------------------------------------
_SINGLE_BUFFER_WEIGHTS = None   # None = not probed yet; see block_forward()


def _const_spec(shape, single_buffer):
    """Whole-array BlockSpec with a constant index map (weight stays VMEM-resident)."""
    nd = len(shape)
    imap = lambda *_ids, _nd=nd: (0,) * _nd
    if single_buffer and hasattr(pl, "Buffered"):
        # Constant blocks never need double buffering; halves their VMEM footprint.
        return pl.BlockSpec(shape, imap, pipeline_mode=pl.Buffered(1))
    return pl.BlockSpec(shape, imap)


def _vmem_limit_bytes(resident_bytes):
    # resident buffers (x2 worst-case double buffering) + headroom, clamped above
    # the 16/32 MiB scoped defaults and below v7x's 64 MiB physical VMEM.
    return int(min(max(2 * resident_bytes + (4 << 20), 32 << 20), 56 << 20))


def _prep_weights(params, n_head, matmul_dtype):
    (ln1_w, ln1_b, w_attn, b_attn, w_attnproj, b_attnproj,
     ln2_w, ln2_b, w_fc, b_fc, w_mlpproj, b_mlpproj) = params
    C = ln1_w.shape[-1]
    hs = C // n_head
    cd = matmul_dtype
    scale = 1.0 / math.sqrt(hs)

    # fold the 1/sqrt(hs) attention scale into the q columns of the fused QKV weight
    col_scale = jnp.concatenate([jnp.full((C,), scale, jnp.float32),
                                 jnp.ones((2 * C,), jnp.float32)])
    w_qkv = (w_attn * col_scale[None, :]).astype(cd)       # (C, 3C) matmul dtype
    b_qkv = b_attn * col_scale[None, :]                    # f32 (bias added in f32)

    wo = w_attnproj.reshape(n_head, hs, C).astype(cd)      # per-head view of c_proj
    return (ln1_w, ln1_b, w_qkv, b_qkv,
            wo, b_attnproj, ln2_w, ln2_b,
            w_fc.astype(cd), b_fc, w_mlpproj.astype(cd), b_mlpproj)


def _run(x, prep, n_head, matmul_dtype, tq, tk, single_buffer):
    B, T, C = x.shape
    H = n_head
    hs = C // H
    cd = matmul_dtype
    itm = jnp.dtype(cd).itemsize
    (ln1_w, ln1_b, w_qkv, b_qkv, wo, bo,
     ln2_w, ln2_b, w_fc, b_fc, w_pr, b_pr) = prep

    if tq is None:
        tq = min(T, 128)
    if tk is None:
        tk = min(T, 128)
    assert T % tq == 0 and T % tk == 0, "T must be divisible by the q/kv tile sizes"

    cs = lambda a: _const_spec(a.shape, single_buffer)
    nb = lambda a: int(a.size) * a.dtype.itemsize

    # ---------------- pass 1: LayerNorm-1 + fused QKV projection ----------------
    resident1 = (nb(ln1_w) + nb(ln1_b) + nb(w_qkv) + nb(b_qkv)
                 + tq * C * 4 + tq * 3 * C * itm)
    qkv = pl.pallas_call(
        functools.partial(qkv_kernel, matmul_dtype=cd),
        out_shape=jax.ShapeDtypeStruct((B, T, 3 * C), cd),
        grid_spec=pltpu.PrefetchScalarGridSpec(
            num_scalar_prefetch=0,
            grid=(B, T // tq),
            in_specs=[pl.BlockSpec((None, tq, C), lambda b, i: (b, i, 0)),
                      cs(ln1_w), cs(ln1_b), cs(w_qkv), cs(b_qkv)],
            out_specs=pl.BlockSpec((None, tq, 3 * C), lambda b, i: (b, i, 0)),
        ),
        compiler_params=pltpu.CompilerParams(
            dimension_semantics=("parallel", "parallel"),
            vmem_limit_bytes=_vmem_limit_bytes(resident1)),
    )(x, ln1_w, ln1_b, w_qkv, b_qkv)

    # wrapper-side layout plumbing (plain XLA): split the fused QKV slab into
    # per-head (B, H, T, hs) q/k/v so the attention kernel never re-slices lanes.
    qh, kh, vh = jnp.split(qkv, 3, axis=-1)
    to_heads = lambda a: a.reshape(B, T, H, hs).transpose(0, 2, 1, 3)
    qh, kh, vh = to_heads(qh), to_heads(kh), to_heads(vh)

    # -------- pass 2: flash attention + out-proj + residual + LN2 + MLP ---------
    resident2 = (nb(wo) + nb(bo) + nb(ln2_w) + nb(ln2_b) + nb(w_fc) + nb(b_fc)
                 + nb(w_pr) + nb(b_pr)
                 + 2 * H * T * hs * itm            # resident K and V (per batch)
                 + H * tq * hs * itm               # q tile
                 + 2 * tq * C * 4                  # x tile + output tile
                 + H * tq * tk * 4                 # live score tile
                 + H * tq * (hs + 2) * 4           # m / l / acc scratch
                 + tq * 4 * C * 4)                 # MLP hidden tile
    out = pl.pallas_call(
        functools.partial(attn_mlp_kernel, tk=tk, matmul_dtype=cd),
        out_shape=jax.ShapeDtypeStruct((B, T, C), x.dtype),
        grid_spec=pltpu.PrefetchScalarGridSpec(
            num_scalar_prefetch=0,
            grid=(B, T // tq),
            in_specs=[pl.BlockSpec((None, tq, C), lambda b, i: (b, i, 0)),        # x tile
                      pl.BlockSpec((None, H, tq, hs), lambda b, i: (b, 0, i, 0)), # q tile
                      pl.BlockSpec((None, H, T, hs), lambda b, i: (b, 0, 0, 0)),  # K resident
                      pl.BlockSpec((None, H, T, hs), lambda b, i: (b, 0, 0, 0)),  # V resident
                      cs(wo), cs(bo), cs(ln2_w), cs(ln2_b),
                      cs(w_fc), cs(b_fc), cs(w_pr), cs(b_pr)],
            out_specs=pl.BlockSpec((None, tq, C), lambda b, i: (b, i, 0)),
            scratch_shapes=[pltpu.VMEM((H, tq, 1), jnp.float32),   # running max m
                            pltpu.VMEM((H, tq, 1), jnp.float32),   # running denom l
                            pltpu.VMEM((H, tq, hs), jnp.float32)], # running acc (P@V)
        ),
        compiler_params=pltpu.CompilerParams(
            dimension_semantics=("parallel", "parallel"),
            vmem_limit_bytes=_vmem_limit_bytes(resident2)),
    )(x, qh, kh, vh, wo, bo, ln2_w, ln2_b, w_fc, b_fc, w_pr, b_pr)
    return out


def block_forward(x, params, n_head, matmul_dtype=jnp.bfloat16, tq=None, tk=None):
    """Full nanoGPT Block forward (inference) as two Pallas TPU kernels."""
    global _SINGLE_BUFFER_WEIGHTS
    prep = _prep_weights(params, n_head, matmul_dtype)
    if _SINGLE_BUFFER_WEIGHTS is None:
        # Probe once whether this JAX build supports single-buffered (Buffered(1))
        # constant-weight BlockSpecs; fall back to default double buffering if not.
        try:
            out = _run(x, prep, n_head, matmul_dtype, tq, tk, single_buffer=True)
            jax.block_until_ready(out)
            _SINGLE_BUFFER_WEIGHTS = True
            return out
        except Exception:
            _SINGLE_BUFFER_WEIGHTS = False
    return _run(x, prep, n_head, matmul_dtype, tq, tk,
                single_buffer=_SINGLE_BUFFER_WEIGHTS)


# ---------------------- pure-JAX reference (for verification) --------------------
def block_reference(x, params, n_head):
    (ln1_w, ln1_b, w_attn, b_attn, w_attnproj, b_attnproj,
     ln2_w, ln2_b, w_fc, b_fc, w_mlpproj, b_mlpproj) = params
    B, T, C = x.shape
    hs = C // n_head

    def ln(z, w, b):
        mu = jnp.mean(z, -1, keepdims=True)
        var = jnp.mean((z - mu) ** 2, -1, keepdims=True)
        return (z - mu) / jnp.sqrt(var + LN_EPS) * w + b

    h1 = ln(x, ln1_w[0], ln1_b[0])
    qkv = h1 @ w_attn + b_attn[0]
    q, k, v = jnp.split(qkv, 3, axis=-1)
    q = q.reshape(B, T, n_head, hs).transpose(0, 2, 1, 3)
    k = k.reshape(B, T, n_head, hs).transpose(0, 2, 1, 3)
    v = v.reshape(B, T, n_head, hs).transpose(0, 2, 1, 3)
    s = jnp.einsum("bhqd,bhkd->bhqk", q, k) / math.sqrt(hs)
    mask = jnp.tril(jnp.ones((T, T), bool))
    s = jnp.where(mask, s, -1e30)
    p = jax.nn.softmax(s, axis=-1)
    y = jnp.einsum("bhqk,bhkd->bhqd", p, v).transpose(0, 2, 1, 3).reshape(B, T, C)
    x = x + (y @ w_attnproj + b_attnproj[0])

    h2 = ln(x, ln2_w[0], ln2_b[0])
    ff = h2 @ w_fc + b_fc[0]
    ff = 0.5 * ff * (1.0 + lax.erf(ff / jnp.sqrt(2.0)))
    x = x + (ff @ w_mlpproj + b_mlpproj[0])
    return x


if __name__ == "__main__":
    def make_params(key, C):
        ks = jax.random.split(key, 8)
        init = lambda k, s: jax.random.normal(k, s, jnp.float32) * 0.02
        return (
            jnp.ones((1, C), jnp.float32), jnp.zeros((1, C), jnp.float32),   # ln1
            init(ks[0], (C, 3 * C)), init(ks[1], (1, 3 * C)),                # c_attn
            init(ks[2], (C, C)), init(ks[3], (1, C)),                        # attn c_proj
            jnp.ones((1, C), jnp.float32), jnp.zeros((1, C), jnp.float32),   # ln2
            init(ks[4], (C, 4 * C)), init(ks[5], (1, 4 * C)),                # mlp c_fc
            init(ks[6], (4 * C, C)), init(ks[7], (1, C)),                    # mlp c_proj
        )

    key = jax.random.PRNGKey(0)
    k1, k2, k3, k4 = jax.random.split(key, 4)

    # small config consistent with the module: n_embed=32, n_head=4, seq len T=8
    B, T, C, H = 2, 8, 32, 4
    params = make_params(k1, C)
    x = jax.random.normal(k2, (B, T, C), jnp.float32)
    ref = block_reference(x, params, H)

    # f32-operand path: tight check vs reference
    out = jax.block_until_ready(block_forward(x, params, H, matmul_dtype=jnp.float32))
    np.testing.assert_allclose(np.asarray(out), np.asarray(ref), rtol=1e-4, atol=1e-4)

    # bf16 MXU-operand path (f32 accumulate, f32 LN/softmax/GELU): looser tolerance
    out_bf16 = jax.block_until_ready(
        block_forward(x, params, H, matmul_dtype=jnp.bfloat16))
    np.testing.assert_allclose(np.asarray(out_bf16), np.asarray(ref),
                               rtol=5e-2, atol=5e-2)

    # slightly larger config exercising the multi-tile flash path, causal tile
    # skipping and lane-dense (C=128) stores
    B2, T2, C2, H2 = 1, 256, 128, 4
    params2 = make_params(k3, C2)
    x2 = jax.random.normal(k4, (B2, T2, C2), jnp.float32)
    ref2 = block_reference(x2, params2, H2)
    out2 = jax.block_until_ready(
        block_forward(x2, params2, H2, matmul_dtype=jnp.float32, tq=64, tk=64))
    np.testing.assert_allclose(np.asarray(out2), np.asarray(ref2),
                               rtol=2e-4, atol=2e-4)

    print("KERNEL_OK")
</pallas_src>

<mosaic_0001>
module attributes {stable_mosaic.version = 11 : i64} {
  func.func @qkv_kernel(%arg0: i32, %arg1: i32, %arg2: memref<1x8x32xf32, #tpu.memory_space<vmem>>, %arg3: memref<1x32xf32, #tpu.memory_space<vmem>>, %arg4: memref<1x32xf32, #tpu.memory_space<vmem>>, %arg5: memref<32x96xf32, #tpu.memory_space<vmem>>, %arg6: memref<1x96xf32, #tpu.memory_space<vmem>>, %arg7: memref<1x8x96xf32, #tpu.memory_space<vmem>>) attributes {dimension_semantics = [#tpu.dimension_semantics<parallel>, #tpu.dimension_semantics<parallel>], iteration_bounds = array<i64: 2, 1>, scalar_prefetch = 0 : i64, scratch_operands = 0 : i64, tpu.core_type = #tpu.core_type<tc>, window_params = [{transform_indices = @transform_0, window_bounds = array<i64: 1, 8, 32>}, {pipeline_mode = #tpu.pipeline_mode<synchronous>, transform_indices = @transform_1, window_bounds = array<i64: 1, 32>}, {pipeline_mode = #tpu.pipeline_mode<synchronous>, transform_indices = @transform_2, window_bounds = array<i64: 1, 32>}, {pipeline_mode = #tpu.pipeline_mode<synchronous>, transform_indices = @transform_3, window_bounds = array<i64: 32, 96>}, {pipeline_mode = #tpu.pipeline_mode<synchronous>, transform_indices = @transform_4, window_bounds = array<i64: 1, 96>}, {transform_indices = @transform_5, window_bounds = array<i64: 1, 8, 96>}]} {
    %c0 = arith.constant 0 : index
    %c0_0 = arith.constant 0 : index
    %c0_1 = arith.constant 0 : index
    %0 = vector.load %arg2[%c0, %c0_0, %c0_1] : memref<1x8x32xf32, #tpu.memory_space<vmem>>, vector<1x8x32xf32>
    %1 = vector.shape_cast %0 : vector<1x8x32xf32> to vector<8x32xf32>
    %c0_2 = arith.constant 0 : index
    %c0_3 = arith.constant 0 : index
    %2 = vector.load %arg3[%c0_2, %c0_3] : memref<1x32xf32, #tpu.memory_space<vmem>>, vector<1x32xf32>
    %c0_4 = arith.constant 0 : index
    %c0_5 = arith.constant 0 : index
    %3 = vector.load %arg4[%c0_4, %c0_5] : memref<1x32xf32, #tpu.memory_space<vmem>>, vector<1x32xf32>
    %cst = arith.constant dense<0.000000e+00> : vector<8xf32>
    %4 = vector.multi_reduction <add>, %1, %cst [1] : vector<8x32xf32> to vector<8xf32>
    %5 = vector.shape_cast %4 : vector<8xf32> to vector<8x1xf32>
    %cst_6 = arith.constant 3.200000e+01 : f32
    %6 = vector.broadcast %cst_6 : f32 to vector<8x1xf32>
    %7 = arith.divf %5, %6 : vector<8x1xf32>
    %8 = vector.broadcast %7 : vector<8x1xf32> to vector<8x32xf32>
    %9 = arith.subf %1, %8 : vector<8x32xf32>
    %10 = arith.mulf %9, %9 : vector<8x32xf32>
    %cst_7 = arith.constant dense<0.000000e+00> : vector<8xf32>
    %11 = vector.multi_reduction <add>, %10, %cst_7 [1] : vector<8x32xf32> to vector<8xf32>
    %12 = vector.shape_cast %11 : vector<8xf32> to vector<8x1xf32>
    %cst_8 = arith.constant 3.200000e+01 : f32
    %13 = vector.broadcast %cst_8 : f32 to vector<8x1xf32>
    %14 = arith.divf %12, %13 : vector<8x1xf32>
    %15 = vector.broadcast %7 : vector<8x1xf32> to vector<8x32xf32>
    %16 = arith.subf %1, %15 : vector<8x32xf32>
    %cst_9 = arith.constant 9.99999974E-6 : f32
    %17 = vector.broadcast %cst_9 : f32 to vector<8x1xf32>
    %18 = arith.addf %14, %17 : vector<8x1xf32>
    %19 = math.rsqrt %18 : vector<8x1xf32>
    %20 = vector.broadcast %19 : vector<8x1xf32> to vector<8x32xf32>
    %21 = arith.mulf %16, %20 : vector<8x32xf32>
    %22 = vector.broadcast %2 : vector<1x32xf32> to vector<8x32xf32>
    %23 = arith.mulf %21, %22 : vector<8x32xf32>
    %24 = vector.broadcast %3 : vector<1x32xf32> to vector<8x32xf32>
    %25 = arith.addf %23, %24 : vector<8x32xf32>
    %c0_10 = arith.constant 0 : index
    %c0_11 = arith.constant 0 : index
    %26 = vector.load %arg5[%c0_10, %c0_11] : memref<32x96xf32, #tpu.memory_space<vmem>>, vector<32x96xf32>
    %cst_12 = arith.constant dense<0.000000e+00> : vector<8x96xf32>
    %27 = tpu.matmul %25, %26, %cst_12 {dimension_numbers = #tpu.dot_dimension_numbers<[1], [0], [0], [1], [0, 0, 1, 1], [], []>} : vector<8x32xf32>, vector<32x96xf32>, vector<8x96xf32> -> vector<8x96xf32>
    %c0_13 = arith.constant 0 : index
    %c0_14 = arith.constant 0 : index
    %28 = vector.load %arg6[%c0_13, %c0_14] : memref<1x96xf32, #tpu.memory_space<vmem>>, vector<1x96xf32>
    %29 = vector.broadcast %28 : vector<1x96xf32> to vector<8x96xf32>
    %30 = arith.addf %27, %29 : vector<8x96xf32>
    %c0_15 = arith.constant 0 : index
    %c0_16 = arith.constant 0 : index
    %c0_17 = arith.constant 0 : index
    %31 = vector.load %arg7[%c0_15, %c0_16, %c0_17] : memref<1x8x96xf32, #tpu.memory_space<vmem>>, vector<1x8x96xf32>
    %32 = vector.shape_cast %31 : vector<1x8x96xf32> to vector<8x96xf32>
    %33 = vector.shape_cast %30 : vector<8x96xf32> to vector<1x8x96xf32>
    tpu.vector_store %arg7[%c0_15, %c0_16, %c0_17], %33 {strides = array<i32>} : memref<1x8x96xf32, #tpu.memory_space<vmem>>, vector<1x8x96xf32>,
    return
  }
  func.func @transform_0(%arg0: i32, %arg1: i32) -> (i32, i32, i32) {
    %c0_i32 = arith.constant 0 : i32
    %c0_i32_0 = arith.constant 0 : i32
    return %arg0, %arg1, %c0_i32 : i32, i32, i32
  }
  func.func @transform_1(%arg0: i32, %arg1: i32) -> (i32, i32) {
    %c0_i32 = arith.constant 0 : i32
    %c0_i32_0 = arith.constant 0 : i32
    %c0_i32_1 = arith.constant 0 : i32
    return %c0_i32, %c0_i32_0 : i32, i32
  }
  func.func @transform_2(%arg0: i32, %arg1: i32) -> (i32, i32) {
    %c0_i32 = arith.constant 0 : i32
    %c0_i32_0 = arith.constant 0 : i32
    %c0_i32_1 = arith.constant 0 : i32
    return %c0_i32, %c0_i32_0 : i32, i32
  }
  func.func @transform_3(%arg0: i32, %arg1: i32) -> (i32, i32) {
    %c0_i32 = arith.constant 0 : i32
    %c0_i32_0 = arith.constant 0 : i32
    %c0_i32_1 = arith.constant 0 : i32
    return %c0_i32, %c0_i32_0 : i32, i32
  }
  func.func @transform_4(%arg0: i32, %arg1: i32) -> (i32, i32) {
    %c0_i32 = arith.constant 0 : i32
    %c0_i32_0 = arith.constant 0 : i32
    %c0_i32_1 = arith.constant 0 : i32
    return %c0_i32, %c0_i32_0 : i32, i32
  }
  func.func @transform_5(%arg0: i32, %arg1: i32) -> (i32, i32, i32) {
    %c0_i32 = arith.constant 0 : i32
    %c0_i32_0 = arith.constant 0 : i32
    return %arg0, %arg1, %c0_i32 : i32, i32, i32
  }
}

module attributes {stable_mosaic.version = 11 : i64} {
  func.func @qkv_kernel(%arg0: i32, %arg1: i32, %arg2: memref<1x8x32xf32, #tpu.memory_space<vmem>>, %arg3: memref<1x32xf32, #tpu.memory_space<vmem>>, %arg4: memref<1x32xf32, #tpu.memory_space<vmem>>, %arg5: memref<32x96xf32, #tpu.memory_space<vmem>>, %arg6: memref<1x96xf32, #tpu.memory_space<vmem>>, %arg7: memref<1x8x96xf32, #tpu.memory_space<vmem>>) attributes {dimension_semantics = [#tpu.dimension_semantics<parallel>, #tpu.dimension_semantics<parallel>], iteration_bounds = array<i64: 2, 1>, scalar_prefetch = 0 : i64, scratch_operands = 0 : i64, tpu.core_type = #tpu.core_type<tc>, window_params = [{transform_indices = @transform_0, window_bounds = array<i64: 1, 8, 32>}, {pipeline_mode = #tpu.pipeline_mode<synchronous>, transform_indices = @transform_1, window_bounds = array<i64: 1, 32>}, {pipeline_mode = #tpu.pipeline_mode<synchronous>, transform_indices = @transform_2, window_bounds = array<i64: 1, 32>}, {pipeline_mode = #tpu.pipeline_mode<synchronous>, transform_indices = @transform_3, window_bounds = array<i64: 32, 96>}, {pipeline_mode = #tpu.pipeline_mode<synchronous>, transform_indices = @transform_4, window_bounds = array<i64: 1, 96>}, {transform_indices = @transform_5, window_bounds = array<i64: 1, 8, 96>}]} {
    %c0 = arith.constant 0 : index
    %c0_0 = arith.constant 0 : index
    %c0_1 = arith.constant 0 : index
    %0 = vector.load %arg2[%c0, %c0_0, %c0_1] : memref<1x8x32xf32, #tpu.memory_space<vmem>>, vector<1x8x32xf32>
    %1 = vector.shape_cast %0 : vector<1x8x32xf32> to vector<8x32xf32>
    %c0_2 = arith.constant 0 : index
    %c0_3 = arith.constant 0 : index
    %2 = vector.load %arg3[%c0_2, %c0_3] : memref<1x32xf32, #tpu.memory_space<vmem>>, vector<1x32xf32>
    %c0_4 = arith.constant 0 : index
    %c0_5 = arith.constant 0 : index
    %3 = vector.load %arg4[%c0_4, %c0_5] : memref<1x32xf32, #tpu.memory_space<vmem>>, vector<1x32xf32>
    %cst = arith.constant dense<0.000000e+00> : vector<8xf32>
    %4 = vector.multi_reduction <add>, %1, %cst [1] : vector<8x32xf32> to vector<8xf32>
    %5 = vector.shape_cast %4 : vector<8xf32> to vector<8x1xf32>
    %cst_6 = arith.constant 3.200000e+01 : f32
    %6 = vector.broadcast %cst_6 : f32 to vector<8x1xf32>
    %7 = arith.divf %5, %6 : vector<8x1xf32>
    %8 = vector.broadcast %7 : vector<8x1xf32> to vector<8x32xf32>
    %9 = arith.subf %1, %8 : vector<8x32xf32>
    %10 = arith.mulf %9, %9 : vector<8x32xf32>
    %cst_7 = arith.constant dense<0.000000e+00> : vector<8xf32>
    %11 = vector.multi_reduction <add>, %10, %cst_7 [1] : vector<8x32xf32> to vector<8xf32>
    %12 = vector.shape_cast %11 : vector<8xf32> to vector<8x1xf32>
    %cst_8 = arith.constant 3.200000e+01 : f32
    %13 = vector.broadcast %cst_8 : f32 to vector<8x1xf32>
    %14 = arith.divf %12, %13 : vector<8x1xf32>
    %15 = vector.broadcast %7 : vector<8x1xf32> to vector<8x32xf32>
    %16 = arith.subf %1, %15 : vector<8x32xf32>
    %cst_9 = arith.constant 9.99999974E-6 : f32
    %17 = vector.broadcast %cst_9 : f32 to vector<8x1xf32>
    %18 = arith.addf %14, %17 : vector<8x1xf32>
    %19 = math.rsqrt %18 : vector<8x1xf32>
    %20 = vector.broadcast %19 : vector<8x1xf32> to vector<8x32xf32>
    %21 = arith.mulf %16, %20 : vector<8x32xf32>
    %22 = vector.broadcast %2 : vector<1x32xf32> to vector<8x32xf32>
    %23 = arith.mulf %21, %22 : vector<8x32xf32>
    %24 = vector.broadcast %3 : vector<1x32xf32> to vector<8x32xf32>
    %25 = arith.addf %23, %24 : vector<8x32xf32>
    %c0_10 = arith.constant 0 : index
    %c0_11 = arith.constant 0 : index
    %26 = vector.load %arg5[%c0_10, %c0_11] : memref<32x96xf32, #tpu.memory_space<vmem>>, vector<32x96xf32>
    %cst_12 = arith.constant dense<0.000000e+00> : vector<8x96xf32>
    %27 = tpu.matmul %25, %26, %cst_12 {dimension_numbers = #tpu.dot_dimension_numbers<[1], [0], [0], [1], [0, 0, 1, 1], [], []>} : vector<8x32xf32>, vector<32x96xf32>, vector<8x96xf32> -> vector<8x96xf32>
    %c0_13 = arith.constant 0 : index
    %c0_14 = arith.constant 0 : index
    %28 = vector.load %arg6[%c0_13, %c0_14] : memref<1x96xf32, #tpu.memory_space<vmem>>, vector<1x96xf32>
    %29 = vector.broadcast %28 : vector<1x96xf32> to vector<8x96xf32>
    %30 = arith.addf %27, %29 : vector<8x96xf32>
    %c0_15 = arith.constant 0 : index
    %c0_16 = arith.constant 0 : index
    %c0_17 = arith.constant 0 : index
    %31 = vector.load %arg7[%c0_15, %c0_16, %c0_17] : memref<1x8x96xf32, #tpu.memory_space<vmem>>, vector<1x8x96xf32>
    %32 = vector.shape_cast %31 : vector<1x8x96xf32> to vector<8x96xf32>
    %33 = vector.shape_cast %30 : vector<8x96xf32> to vector<1x8x96xf32>
    tpu.vector_store %arg7[%c0_15, %c0_16, %c0_17], %33 {strides = array<i32>} : memref<1x8x96xf32, #tpu.memory_space<vmem>>, vector<1x8x96xf32>,
    return
  }
  func.func @transform_0(%arg0: i32, %arg1: i32) -> (i32, i32, i32) {
    %c0_i32 = arith.constant 0 : i32
    %c0_i32_0 = arith.constant 0 : i32
    return %arg0, %arg1, %c0_i32 : i32, i32, i32
  }
  func.func @transform_1(%arg0: i32, %arg1: i32) -> (i32, i32) {
    %c0_i32 = arith.constant 0 : i32
    %c0_i32_0 = arith.constant 0 : i32
    %c0_i32_1 = arith.constant 0 : i32
    return %c0_i32, %c0_i32_0 : i32, i32
  }
  func.func @transform_2(%arg0: i32, %arg1: i32) -> (i32, i32) {
    %c0_i32 = arith.constant 0 : i32
    %c0_i32_0 = arith.constant 0 : i32
    %c0_i32_1 = arith.constant 0 : i32
    return %c0_i32, %c0_i32_0 : i32, i32
  }
  func.func @transform_3(%arg0: i32, %arg1: i32) -> (i32, i32) {
    %c0_i32 = arith.constant 0 : i32
    %c0_i32_0 = arith.constant 0 : i32
    %c0_i32_1 = arith.constant 0 : i32
    return %c0_i32, %c0_i32_0 : i32, i32
  }
  func.func @transform_4(%arg0: i32, %arg1: i32) -> (i32, i32) {
    %c0_i32 = arith.constant 0 : i32
    %c0_i32_0 = arith.constant 0 : i32
    %c0_i32_1 = arith.constant 0 : i32
    return %c0_i32, %c0_i32_0 : i32, i32
  }
  func.func @transform_5(%arg0: i32, %arg1: i32) -> (i32, i32, i32) {
    %c0_i32 = arith.constant 0 : i32
    %c0_i32_0 = arith.constant 0 : i32
    return %arg0, %arg1, %c0_i32 : i32, i32, i32
  }
}

</mosaic_0001>

<bundles_post_ra>
// kernel: tpu_custom_call.1
= control target key start
LH: loop header
LB: loop body
LE: loop exit
PB: predicated region body
PF: predicated region fallthrough
CT: control target
= control target key end

     0   :  { %s975_s0 = inlined_call_operand.hbm [shape: f32[2,8,32], index: 0, kind: input, shape index: {}]   ;;  %s976_s1 = inlined_call_operand.vmem [shape: f32[1,32], index: 1, kind: input, shape index: {}]   ;;  %s977_s2 = inlined_call_operand.vmem [shape: f32[1,32], index: 2, kind: input, shape index: {}]   ;;  %s978_s3 = inlined_call_operand.hbm [shape: f32[32,96], index: 3, kind: input, shape index: {}]   ;;  %s979_s4 = inlined_call_operand.vmem [shape: f32[1,96], index: 4, kind: input, shape index: {}]   ;;  %s980_s5 = inlined_call_operand.hbm [shape: f32[2,8,96], index: 5, kind: output, shape index: {}]  }
   0x1   :  { %983 = sst [smem:[#allocation12_spill]] %s978_s3 }
   0x2   :  { %10 = vsyncpa [#allocation3], 0 }
   0x3   :  { %12 = vsyncpa [#allocation3 + $0x1], 0 }
   0x4   :  { %13 = vsyncpa [#allocation6], 0 }
   0x5   :  { %14 = vsyncpa [#allocation4], 0 }
   0x6   :  { %16 = vsyncpa [#allocation4 + $0x1], 0  ;;  %s786_s18 = smov 0   ;;  %s788_s19 = smov 0  }
   0x7   :  { %s790_s20 = smov 0   ;;  %s792_s21 = smov 0  }
   0x8   :  { %s794_s22 = smov 0   ;;  %s796_s23 = smov 0  }
   0x9 LB: > { %s495_s24 = sadd.s32 4294967295, %s747_s23   ;;  %s496_s25 = sadd.s32 4294967294, %s747_s23   ;;  %s747_s23 = sphi %s796_s23, %s22_s23   ;;  %s743_s22 = sphi %s794_s22, %s1003_s22   ;;  %s739_s21 = sphi %s792_s21, %s1002_s21   ;;  %s735_s20 = sphi %s790_s20, %s1001_s20   ;;  %s731_s19 = sphi %s788_s19, %s1000_s19   ;;  %s727_s18 = sphi %s786_s18, %s999_s18  }
   0xa   : > { %p56_p0 = scmp.ne.s32.totalorder %s731_s19, %s727_s18  ;;  %p820_p1 = scmp.eq.s32.totalorder %s495_s24, 0 }
   0xb   : > { %p824_p2 = scmp.eq.s32.totalorder %s495_s24, 1  ;;  %p172_p3 = scmp.eq.s32.totalorder %s496_s25, 1 }
   0xc   : > { %p830_p4 = por %p820_p1, %p56_p0  ;;  %p497_p5 = scmp.ge.s32.totalorder %s747_s23, 1 }
   0xd   : > { %p835_p6 = por %p172_p3, %p56_p0  ;;  %p179_p7 = scmp.lt.s32.totalorder %s747_s23, 3 }
   0xe   : > { %s986_s28 = scalar_select %p830_p4, 1, 0 }
   0xf   : > { %s987_s29 = scalar_select %p835_p6, 1, 0 }
  0x10   : > { %p840_p8 = pnand %p497_p5, %p179_p7  ;;  %s749_s6 = smov [#allocation5]  }
  0x11   : > { %s197_s7 = sshll.u32 %s749_s6, 4  ;;  %s34_s9 = sadd.s32 1, %s743_s22  ;;  %s198_s7 = int_to_ptr.vmem [resolvable:$true] %s197_s7 }
  0x12   : > { %p538_p9 = pneg %p840_p8  ;;  %s620_s10 = scalar_lea.vmem %s198_s7, 512 }
  0x13   : > { %p621_p13 = scmp.ne.s32.totalorder %s198_s7, %s620_s10  ;;  %p628_p5 = scmp.lt.s32.totalorder %s198_s7, %s198_s7 }
  0x14   : > { %p849_p11 = pnand %p538_p9, %p820_p1  ;;  %p629_p7 = scmp.lt.s32.totalorder %s620_s10, %s620_s10 }
  0x16   : > { %p611_p12 = pneg %p849_p11  ;;  %p630_p6 = por %p629_p7, %p628_p5 }
  0x18   : > { %p623_p0 = pnand %p621_p13, %p611_p12 }
  0x1a   : > { %p624_p3 = pneg %p623_p0 }
  0x1c   : > { %p631_p4 = pnand %p630_p6, %p624_p3 }
  0x1e   : > { %634 = shalt.err (!%p631_p4)
}
  0x1f   : > { %s750_s11 = smov 128   ;;  %s751_s12 = smov 8  }
  0x20   : > { %s990_s3 = sld [smem:[#allocation12_spill]]  ;;  %p36_p6 = scmp.ge.s32.totalorder %s34_s9, 2 }
  0x21   : > { %s43_s15 = sadd.s32 1, %s735_s20  ;;  %p50_p4 = scmp.ne.s32.totalorder %s735_s20, %s731_s19 }
  0x22   : > { %p51_p9 = scmp.eq.s32.totalorder %s747_s23, 0  ;;  %s1005_s9 = smov (%p36_p6, %s34_s9), 0 }
  0x23   : > { %991 = sst [smem:[#allocation11_spill]] %s1005_s9  ;;  %p873_p13 = por %p824_p2, %p50_p4 }
  0x24   : > { %p867_p12 = por %p51_p9, %p50_p4  ;;  %s38_s24 = ssub.s32 %s743_s22, %s1005_s9 }
  0x25   : > { %p551_p0 = scmp.lt.s32.totalorder %s747_s23, 2  ;;  %s214_s25 = sand.u32 1, %s735_s20  }
  0x26   : > { %541 = dma.hbm_to_vmem [thread:$0]  (!%p849_p11), %s990_s3, 512, %s198_s7, [#allocation6], %s750_s11, %s750_s11, %s751_s12  }
  0x27   : > { %p41_p11 = scmp.eq.s32.totalorder %s38_s24, 0  ;;  %s500_s6 = sshll.u32 %s214_s25, 3 }
  0x28   : > { %s501_s8 = sshll.u32 %s743_s22, 7  ;;  %s218_s13 = scalar_lea.vmem [#allocation2], %s500_s6 }
  0x29   : > { %s882_s7 = scalar_select %p41_p11, %s735_s20, %s43_s15  }
  0x2a   : > { %s224_s12 = scalar_lea.hbm %s975_s0, %s501_s8  ;;  %s226_s14 = sshll.u32 %s218_s13, 4  ;;  %s227_s14 = int_to_ptr.vmem [resolvable:$true] %s226_s14 }
  0x2b   : > { %p890_p2 = pnand %p551_p0, %p867_p12  ;;  %s215_s3 = scalar_lea.sflag [#allocation3], %s214_s25 }
  0x2c   : > { %s648_s24 = scalar_lea.vmem %s227_s14, 128  ;;  %s752_s15 = smov [#allocation2]  }
  0x2d   : > { %p637_p3 = pneg %p890_p2  ;;  %p649_p5 = scmp.ne.s32.totalorder %s227_s14, %s648_s24 }
  0x2e   : > { %s653_s9 = sshll.u32 %s752_s15, 4  ;;  %s654_s9 = int_to_ptr.vmem [resolvable:$false] %s653_s9 }
  0x2f   : > { %p651_p7 = pnand %p649_p5, %p637_p3  ;;  %s655_s8 = scalar_lea.vmem %s654_s9, 256 }
  0x30   : > { %p656_p4 = scmp.lt.s32.totalorder %s227_s14, %s654_s9  ;;  %p657_p9 = scmp.lt.s32.totalorder %s655_s8, %s648_s24 }
  0x31   : > { %p652_p6 = pneg %p651_p7 }
  0x32   : > { %p658_p11 = por %p657_p9, %p656_p4 }
  0x34   : > { %p659_p10 = pnand %p658_p11, %p652_p6 }
  0x36   : > { %662 = shalt.err (!%p659_p10)
}
  0x37   : > { %545 = dma.hbm_to_vmem [thread:$0]  (!%p890_p2), %s224_s12, 128, %s227_s14, %s215_s3  }
  0x38   : > { %235 = sbr.rel (%p840_p8) target bundleno = 581 (0x245), region = 40  ;;  %s901_s16 = sand.u32 (!%p840_p8), 1, %s731_s19  }
  0x39   : > { %s503_s25 = sshll.u32 (!%p840_p8), %s901_s16, 3  ;;  %s238_s6 = scalar_lea.sflag (!%p840_p8), [#allocation3], %s901_s16 }
  0x3a   : > { %s241_s9 = scalar_lea.vmem (!%p840_p8), [#allocation2], %s503_s25  ;;  %p995_p12 = scmp.ne.s32.totalorder (!%p840_p8), %s986_s28, 0 }
  0x3d   : > { %714 = dma.done.wait (%p995_p12), %s238_s6, 128  }
  0x3e   : > { %716 = vsyncadd (%p995_p12), %s238_s6, 4294967168 }
  0x3f   : > { %718 = dma.done.wait (%p820_p1), [#allocation6], 512  }
  0x40   : > { %720 = vsyncadd (%p820_p1), [#allocation6], 4294966784  ;;  %vm275_vm0 = vcmask 261120   ;;  %v272_v0 = vld [vmem:[%s241_s9] sm:$0xff]  ;;  %v753_v8 = vmov 0.0   ;;  %vm754_vm1 = vmmov 0  }
  0x41   : > { %v276_v1 = vsel %vm275_vm0, %v272_v0, 0.0  ;;  %v307_v7 = vld [vmem:[#allocation5 + $0x18] sm:$0xff]  ;;  %519 = vmatprep.subr.mxu0 %v753_v8  ;;  %v306_v9 = vld [vmem:[#allocation5 + $0x10] sm:$0xff]  ;;  %527 = vmatprep.mubr.msk.f32.mxu0 %vm754_vm1, %v753_v8  ;;  %v305_v10 = vld [vmem:[#allocation5 + $0x8] sm:$0xff]  ;;  %s511_s12 = sshll.u32 %s739_s21, 7  ;;  %s271_s13 = scalar_lea.vmem [#allocation7], %s503_s25 }
  0x42   : > { %277 = vadd.xlane.f32.xlu0 %v276_v1  ;;  %520 = vmatpush3.msra.mxu0 %v307_v7  ;;  %v304_v11 = vld [vmem:[#allocation5] sm:$0xff]  ;;  %v506_v16 = vld [vmem:[%s976_s1] ss:$0 sm:$0xff]  ;;  %s405_s14 = sshll.u32 %s271_s13, 4  ;;  %vm388_vm2 = vcmask 785408   ;;  %s933_s15 = scalar_lea.hbm %s980_s5, %s511_s12  ;;  %s406_s14 = int_to_ptr.vmem [resolvable:$true] %s405_s14 }
  0x43   : > { %521 = vmatprep.subr.mxu0 %v753_v8  ;;  %v507_v18 = vld [vmem:[%s977_s2] ss:$0 sm:$0xff]  ;;  %s391_s8 = scalar_lea.sflag [#allocation4], %s901_s16  ;;  %s663_s6 = scalar_lea.vmem %s406_s14, 128 }
  0x44   : > { %522 = vmatpush3.msra.mxu0 %v306_v9  ;;  %v508_v21 = vld [vmem:[%s979_s4] ss:$0 sm:$0xff]  ;;  %p664_p1 = scmp.ne.s32.totalorder %s406_s14, %s663_s6  ;;  %s755_s21 = smov [#allocation7]  }
  0x45   : > { %523 = vmatprep.subr.mxu0 %v753_v8  ;;  %s667_s25 = sshll.u32 %s755_s21, 4  ;;  %s668_s25 = int_to_ptr.vmem [resolvable:$false] %s667_s25 }
  0x46   : > { %524 = vmatpush3.msra.mxu0 %v305_v10  ;;  %p665_p8 = pnand %p664_p1, %p873_p13  ;;  %s669_s9 = scalar_lea.vmem %s668_s25, 256 }
  0x47   : > { %525 = vmatprep.subr.mxu0 %v753_v8  ;;  %p670_p0 = scmp.lt.s32.totalorder %s406_s14, %s668_s25  ;;  %p671_p2 = scmp.lt.s32.totalorder %s669_s9, %s663_s6 }
  0x48   : > { %526 = vmatpush3.msra.mxu0 %v304_v11  ;;  %p666_p10 = pneg %p665_p8 }
  0x49   : > { %p672_p3 = por %p671_p2, %p670_p0 }
  0x4b   : > { %p673_p5 = pnand %p672_p3, %p666_p10 }
  0xcb   : > { %v278_v2 = vpop.xlane.xlu0 %277 }
  0xcc   : > { %v280_v3 = vmul.f32 0.03125, %v278_v2 }
  0xce   : > { %v281_v4 = vsub.f32 %v272_v0, %v280_v3 }
  0xd0   : > { %v282_v5 = vmul.f32 %v281_v4, %v281_v4 }
  0xd2   : > { %v283_v6 = vsel %vm275_vm0, %v282_v5, 0.0 }
  0xd3   : > { %284 = vadd.xlane.f32.xlu0 %v283_v6 }
 0x15c   : > { %v285_v12 = vpop.xlane.xlu0 %284 }
 0x15d   : > { %v286_v13 = vmul.f32 0.03125, %v285_v12 }
 0x15f   : > { %v287_v14 = vadd.f32 1e-05, %v286_v13 }
 0x161   : > { %607 = vrsqrt.f32 %v287_v14 }
 0x16e   : > { %v608_v15 = vpop.eup %607 }
 0x16f   : > { %v289_v17 = vmul.f32 %v608_v15, %v281_v4 }
 0x171   : > { %v296_v19 = vmul.f32 %v506_v16, %v289_v17 }
 0x173   : > { %v303_v20 = vadd.f32 %v507_v18, %v296_v19 }
 0x175   : > { %528 = vmatmul.mubr.msk.f32.vlgmr.msra.gmra.mxu0 %vm275_vm0, %v303_v20 }
 0x235   : > { %v384_v22 = vpop.f32.mrf.mxu0 }
 0x236   : > { %v385_v23 = vadd.f32 %v508_v21, %v384_v22 }
 0x237   : > { %v529_v24 = vpop.f32.mrf.mxu0 }
 0x238   : > { %389 = vst.msk [vmem:[%s271_s13] sm:$0xff] %vm388_vm2, %v385_v23 }
 0x239   : > { %676 = shalt.err (!%p673_p5)
}
 0x23a   : > { %s677_s3 = scalar_lea.hbm %s933_s15, 128  ;;  %s681_s28 = scalar_lea.hbm %s980_s5, 256 }
 0x23b   : > { %p678_p7 = scmp.ne.s32.totalorder %s933_s15, %s677_s3  ;;  %p682_p9 = scmp.lt.s32.totalorder %s933_s15, %s980_s5 }
 0x23c   : > { %p683_p11 = scmp.lt.s32.totalorder %s681_s28, %s677_s3 }
 0x23d   : > { %p679_p6 = pnand %p678_p7, %p873_p13 }
 0x23e   : > { %p684_p12 = por %p683_p11, %p682_p9 }
 0x23f   : > { %p680_p4 = pneg %p679_p6 }
 0x241   : > { %p685_p1 = pnand %p684_p12, %p680_p4 }
 0x243   : > { %688 = shalt.err (!%p685_p1)
}
 0x244   : > { %536 = dma.vmem_to_hbm [thread:$0]  (%p873_p13), %s406_s14, 128, %s933_s15, %s391_s8  }
 0x245 PF: > { %s417_s11 = sand.u32 1, %s727_s18   ;;  %p996_p8 = scmp.ne.s32.totalorder %s987_s29, 0 }
 0x246   : > { %p997_p10 = scmp.ge.s32.totalorder %s747_s23, 2  ;;  %s418_s12 = scalar_lea.sflag [#allocation4], %s417_s11 }
 0x248   : > { %p547_p0 = pnand %p997_p10, %p996_p8 }
 0x24a   : > { %p548_p2 = pneg %p547_p0 }
 0x24c   : > { %722 = dma.done.wait (%p548_p2), %s418_s12, 128  }
 0x24d   : > { %724 = vsyncadd (%p548_p2), %s418_s12, 4294967168  ;;  %s22_s23 = sadd.s32 1, %s747_s23   ;;  %s998_s17 = sld [smem:[#allocation11_spill]] }
 0x24e   : > { %p19_p3 = scmp.ge.s32.totalorder %s22_s23, 4   ;;  %s999_s18 = smov %s731_s19 }
 0x24f   : > { %s1000_s19 = smov %s735_s20  ;;  %s1001_s20 = smov %s882_s7 }
 0x250   : > { %s1002_s21 = smov %s743_s22  ;;  %21 = sbr.rel (!%p19_p3) target bundleno = 9 (0x9), region = 89 }
 0x253   : > { %s1003_s22 = smov %s998_s17 }
 0x255   :  { %423 = vsyncpa [#allocation3], 1 }
 0x256   :  { %425 = vsyncpa [#allocation3 + $0x1], 1 }
 0x257   :  { %426 = vsyncpa [#allocation6], 1 }
 0x258   :  { %427 = vsyncpa [#allocation4], 1 }
 0x259   :  { %429 = vsyncpa [#allocation4 + $0x1], 1 }

// kernel: tpu_custom_call.1
= control target key start
LH: loop header
LB: loop body
LE: loop exit
PB: predicated region body
PF: predicated region fallthrough
CT: control target
= control target key end

     0   :  { %s975_s0 = inlined_call_operand.hbm [shape: f32[2,8,32], index: 0, kind: input, shape index: {}]   ;;  %s976_s1 = inlined_call_operand.vmem [shape: f32[1,32], index: 1, kind: input, shape index: {}]   ;;  %s977_s2 = inlined_call_operand.vmem [shape: f32[1,32], index: 2, kind: input, shape index: {}]   ;;  %s978_s3 = inlined_call_operand.hbm [shape: f32[32,96], index: 3, kind: input, shape index: {}]   ;;  %s979_s4 = inlined_call_operand.vmem [shape: f32[1,96], index: 4, kind: input, shape index: {}]   ;;  %s980_s5 = inlined_call_operand.hbm [shape: f32[2,8,96], index: 5, kind: output, shape index: {}]  }
   0x1   :  { %983 = sst [smem:[#allocation12_spill]] %s978_s3 }
   0x2   :  { %10 = vsyncpa [#allocation3], 0 }
   0x3   :  { %12 = vsyncpa [#allocation3 + $0x1], 0 }
   0x4   :  { %13 = vsyncpa [#allocation6], 0 }
   0x5   :  { %14 = vsyncpa [#allocation4], 0 }
   0x6   :  { %16 = vsyncpa [#allocation4 + $0x1], 0  ;;  %s786_s18 = smov 0   ;;  %s788_s19 = smov 0  }
   0x7   :  { %s790_s20 = smov 0   ;;  %s792_s21 = smov 0  }
   0x8   :  { %s794_s22 = smov 0   ;;  %s796_s23 = smov 0  }
   0x9 LB: > { %s495_s24 = sadd.s32 4294967295, %s747_s23   ;;  %s496_s25 = sadd.s32 4294967294, %s747_s23   ;;  %s747_s23 = sphi %s796_s23, %s22_s23   ;;  %s743_s22 = sphi %s794_s22, %s1003_s22   ;;  %s739_s21 = sphi %s792_s21, %s1002_s21   ;;  %s735_s20 = sphi %s790_s20, %s1001_s20   ;;  %s731_s19 = sphi %s788_s19, %s1000_s19   ;;  %s727_s18 = sphi %s786_s18, %s999_s18  }
   0xa   : > { %p56_p0 = scmp.ne.s32.totalorder %s731_s19, %s727_s18  ;;  %p820_p1 = scmp.eq.s32.totalorder %s495_s24, 0 }
   0xb   : > { %p824_p2 = scmp.eq.s32.totalorder %s495_s24, 1  ;;  %p172_p3 = scmp.eq.s32.totalorder %s496_s25, 1 }
   0xc   : > { %p830_p4 = por %p820_p1, %p56_p0  ;;  %p497_p5 = scmp.ge.s32.totalorder %s747_s23, 1 }
   0xd   : > { %p835_p6 = por %p172_p3, %p56_p0  ;;  %p179_p7 = scmp.lt.s32.totalorder %s747_s23, 3 }
   0xe   : > { %s986_s28 = scalar_select %p830_p4, 1, 0 }
   0xf   : > { %s987_s29 = scalar_select %p835_p6, 1, 0 }
  0x10   : > { %p840_p8 = pnand %p497_p5, %p179_p7  ;;  %s749_s6 = smov [#allocation5]  }
  0x11   : > { %s197_s7 = sshll.u32 %s749_s6, 4  ;;  %s34_s9 = sadd.s32 1, %s743_s22  ;;  %s198_s7 = int_to_ptr.vmem [resolvable:$true] %s197_s7 }
  0x12   : > { %p538_p9 = pneg %p840_p8  ;;  %s620_s10 = scalar_lea.vmem %s198_s7, 512 }
  0x13   : > { %p621_p13 = scmp.ne.s32.totalorder %s198_s7, %s620_s10  ;;  %p628_p5 = scmp.lt.s32.totalorder %s198_s7, %s198_s7 }
  0x14   : > { %p849_p11 = pnand %p538_p9, %p820_p1  ;;  %p629_p7 = scmp.lt.s32.totalorder %s620_s10, %s620_s10 }
  0x16   : > { %p611_p12 = pneg %p849_p11  ;;  %p630_p6 = por %p629_p7, %p628_p5 }
  0x18   : > { %p623_p0 = pnand %p621_p13, %p611_p12 }
  0x1a   : > { %p624_p3 = pneg %p623_p0 }
  0x1c   : > { %p631_p4 = pnand %p630_p6, %p624_p3 }
  0x1e   : > { %634 = shalt.err (!%p631_p4)
}
  0x1f   : > { %s750_s11 = smov 128   ;;  %s751_s12 = smov 8  }
  0x20   : > { %s990_s3 = sld [smem:[#allocation12_spill]]  ;;  %p36_p6 = scmp.ge.s32.totalorder %s34_s9, 2 }
  0x21   : > { %s43_s15 = sadd.s32 1, %s735_s20  ;;  %p50_p4 = scmp.ne.s32.totalorder %s735_s20, %s731_s19 }
  0x22   : > { %p51_p9 = scmp.eq.s32.totalorder %s747_s23, 0  ;;  %s1005_s9 = smov (%p36_p6, %s34_s9), 0 }
  0x23   : > { %991 = sst [smem:[#allocation11_spill]] %s1005_s9  ;;  %p873_p13 = por %p824_p2, %p50_p4 }
  0x24   : > { %p867_p12 = por %p51_p9, %p50_p4  ;;  %s38_s24 = ssub.s32 %s743_s22, %s1005_s9 }
  0x25   : > { %p551_p0 = scmp.lt.s32.totalorder %s747_s23, 2  ;;  %s214_s25 = sand.u32 1, %s735_s20  }
  0x26   : > { %541 = dma.hbm_to_vmem [thread:$0]  (!%p849_p11), %s990_s3, 512, %s198_s7, [#allocation6], %s750_s11, %s750_s11, %s751_s12  }
  0x27   : > { %p41_p11 = scmp.eq.s32.totalorder %s38_s24, 0  ;;  %s500_s6 = sshll.u32 %s214_s25, 3 }
  0x28   : > { %s501_s8 = sshll.u32 %s743_s22, 7  ;;  %s218_s13 = scalar_lea.vmem [#allocation2], %s500_s6 }
  0x29   : > { %s882_s7 = scalar_select %p41_p11, %s735_s20, %s43_s15  }
  0x2a   : > { %s224_s12 = scalar_lea.hbm %s975_s0, %s501_s8  ;;  %s226_s14 = sshll.u32 %s218_s13, 4  ;;  %s227_s14 = int_to_ptr.vmem [resolvable:$true] %s226_s14 }
  0x2b   : > { %p890_p2 = pnand %p551_p0, %p867_p12  ;;  %s215_s3 = scalar_lea.sflag [#allocation3], %s214_s25 }
  0x2c   : > { %s648_s24 = scalar_lea.vmem %s227_s14, 128  ;;  %s752_s15 = smov [#allocation2]  }
  0x2d   : > { %p637_p3 = pneg %p890_p2  ;;  %p649_p5 = scmp.ne.s32.totalorder %s227_s14, %s648_s24 }
  0x2e   : > { %s653_s9 = sshll.u32 %s752_s15, 4  ;;  %s654_s9 = int_to_ptr.vmem [resolvable:$false] %s653_s9 }
  0x2f   : > { %p651_p7 = pnand %p649_p5, %p637_p3  ;;  %s655_s8 = scalar_lea.vmem %s654_s9, 256 }
  0x30   : > { %p656_p4 = scmp.lt.s32.totalorder %s227_s14, %s654_s9  ;;  %p657_p9 = scmp.lt.s32.totalorder %s655_s8, %s648_s24 }
  0x31   : > { %p652_p6 = pneg %p651_p7 }
  0x32   : > { %p658_p11 = por %p657_p9, %p656_p4 }
  0x34   : > { %p659_p10 = pnand %p658_p11, %p652_p6 }
  0x36   : > { %662 = shalt.err (!%p659_p10)
}
  0x37   : > { %545 = dma.hbm_to_vmem [thread:$0]  (!%p890_p2), %s224_s12, 128, %s227_s14, %s215_s3  }
  0x38   : > { %235 = sbr.rel (%p840_p8) target bundleno = 581 (0x245), region = 40  ;;  %s901_s16 = sand.u32 (!%p840_p8), 1, %s731_s19  }
  0x39   : > { %s503_s25 = sshll.u32 (!%p840_p8), %s901_s16, 3  ;;  %s238_s6 = scalar_lea.sflag (!%p840_p8), [#allocation3], %s901_s16 }
  0x3a   : > { %s241_s9 = scalar_lea.vmem (!%p840_p8), [#allocation2], %s503_s25  ;;  %p995_p12 = scmp.ne.s32.totalorder (!%p840_p8), %s986_s28, 0 }
  0x3d   : > { %714 = dma.done.wait (%p995_p12), %s238_s6, 128  }
  0x3e   : > { %716 = vsyncadd (%p995_p12), %s238_s6, 4294967168 }
  0x3f   : > { %718 = dma.done.wait (%p820_p1), [#allocation6], 512  }
  0x40   : > { %720 = vsyncadd (%p820_p1), [#allocation6], 4294966784  ;;  %vm275_vm0 = vcmask 261120   ;;  %v272_v0 = vld [vmem:[%s241_s9] sm:$0xff]  ;;  %v753_v8 = vmov 0.0   ;;  %vm754_vm1 = vmmov 0  }
  0x41   : > { %v276_v1 = vsel %vm275_vm0, %v272_v0, 0.0  ;;  %v307_v7 = vld [vmem:[#allocation5 + $0x18] sm:$0xff]  ;;  %519 = vmatprep.subr.mxu0 %v753_v8  ;;  %v306_v9 = vld [vmem:[#allocation5 + $0x10] sm:$0xff]  ;;  %527 = vmatprep.mubr.msk.f32.mxu0 %vm754_vm1, %v753_v8  ;;  %v305_v10 = vld [vmem:[#allocation5 + $0x8] sm:$0xff]  ;;  %s511_s12 = sshll.u32 %s739_s21, 7  ;;  %s271_s13 = scalar_lea.vmem [#allocation7], %s503_s25 }
  0x42   : > { %277 = vadd.xlane.f32.xlu0 %v276_v1  ;;  %520 = vmatpush3.msra.mxu0 %v307_v7  ;;  %v304_v11 = vld [vmem:[#allocation5] sm:$0xff]  ;;  %v506_v16 = vld [vmem:[%s976_s1] ss:$0 sm:$0xff]  ;;  %s405_s14 = sshll.u32 %s271_s13, 4  ;;  %vm388_vm2 = vcmask 785408   ;;  %s933_s15 = scalar_lea.hbm %s980_s5, %s511_s12  ;;  %s406_s14 = int_to_ptr.vmem [resolvable:$true] %s405_s14 }
  0x43   : > { %521 = vmatprep.subr.mxu0 %v753_v8  ;;  %v507_v18 = vld [vmem:[%s977_s2] ss:$0 sm:$0xff]  ;;  %s391_s8 = scalar_lea.sflag [#allocation4], %s901_s16  ;;  %s663_s6 = scalar_lea.vmem %s406_s14, 128 }
  0x44   : > { %522 = vmatpush3.msra.mxu0 %v306_v9  ;;  %v508_v21 = vld [vmem:[%s979_s4] ss:$0 sm:$0xff]  ;;  %p664_p1 = scmp.ne.s32.totalorder %s406_s14, %s663_s6  ;;  %s755_s21 = smov [#allocation7]  }
  0x45   : > { %523 = vmatprep.subr.mxu0 %v753_v8  ;;  %s667_s25 = sshll.u32 %s755_s21, 4  ;;  %s668_s25 = int_to_ptr.vmem [resolvable:$false] %s667_s25 }
  0x46   : > { %524 = vmatpush3.msra.mxu0 %v305_v10  ;;  %p665_p8 = pnand %p664_p1, %p873_p13  ;;  %s669_s9 = scalar_lea.vmem %s668_s25, 256 }
  0x47   : > { %525 = vmatprep.subr.mxu0 %v753_v8  ;;  %p670_p0 = scmp.lt.s32.totalorder %s406_s14, %s668_s25  ;;  %p671_p2 = scmp.lt.s32.totalorder %s669_s9, %s663_s6 }
  0x48   : > { %526 = vmatpush3.msra.mxu0 %v304_v11  ;;  %p666_p10 = pneg %p665_p8 }
  0x49   : > { %p672_p3 = por %p671_p2, %p670_p0 }
  0x4b   : > { %p673_p5 = pnand %p672_p3, %p666_p10 }
  0xcb   : > { %v278_v2 = vpop.xlane.xlu0 %277 }
  0xcc   : > { %v280_v3 = vmul.f32 0.03125, %v278_v2 }
  0xce   : > { %v281_v4 = vsub.f32 %v272_v0, %v280_v3 }
  0xd0   : > { %v282_v5 = vmul.f32 %v281_v4, %v281_v4 }
  0xd2   : > { %v283_v6 = vsel %vm275_vm0, %v282_v5, 0.0 }
  0xd3   : > { %284 = vadd.xlane.f32.xlu0 %v283_v6 }
 0x15c   : > { %v285_v12 = vpop.xlane.xlu0 %284 }
 0x15d   : > { %v286_v13 = vmul.f32 0.03125, %v285_v12 }
 0x15f   : > { %v287_v14 = vadd.f32 1e-05, %v286_v13 }
 0x161   : > { %607 = vrsqrt.f32 %v287_v14 }
 0x16e   : > { %v608_v15 = vpop.eup %607 }
 0x16f   : > { %v289_v17 = vmul.f32 %v608_v15, %v281_v4 }
 0x171   : > { %v296_v19 = vmul.f32 %v506_v16, %v289_v17 }
 0x173   : > { %v303_v20 = vadd.f32 %v507_v18, %v296_v19 }
 0x175   : > { %528 = vmatmul.mubr.msk.f32.vlgmr.msra.gmra.mxu0 %vm275_vm0, %v303_v20 }
 0x235   : > { %v384_v22 = vpop.f32.mrf.mxu0 }
 0x236   : > { %v385_v23 = vadd.f32 %v508_v21, %v384_v22 }
 0x237   : > { %v529_v24 = vpop.f32.mrf.mxu0 }
 0x238   : > { %389 = vst.msk [vmem:[%s271_s13] sm:$0xff] %vm388_vm2, %v385_v23 }
 0x239   : > { %676 = shalt.err (!%p673_p5)
}
 0x23a   : > { %s677_s3 = scalar_lea.hbm %s933_s15, 128  ;;  %s681_s28 = scalar_lea.hbm %s980_s5, 256 }
 0x23b   : > { %p678_p7 = scmp.ne.s32.totalorder %s933_s15, %s677_s3  ;;  %p682_p9 = scmp.lt.s32.totalorder %s933_s15, %s980_s5 }
 0x23c   : > { %p683_p11 = scmp.lt.s32.totalorder %s681_s28, %s677_s3 }
 0x23d   : > { %p679_p6 = pnand %p678_p7, %p873_p13 }
 0x23e   : > { %p684_p12 = por %p683_p11, %p682_p9 }
 0x23f   : > { %p680_p4 = pneg %p679_p6 }
 0x241   : > { %p685_p1 = pnand %p684_p12, %p680_p4 }
 0x243   : > { %688 = shalt.err (!%p685_p1)
}
 0x244   : > { %536 = dma.vmem_to_hbm [thread:$0]  (%p873_p13), %s406_s14, 128, %s933_s15, %s391_s8  }
 0x245 PF: > { %s417_s11 = sand.u32 1, %s727_s18   ;;  %p996_p8 = scmp.ne.s32.totalorder %s987_s29, 0 }
 0x246   : > { %p997_p10 = scmp.ge.s32.totalorder %s747_s23, 2  ;;  %s418_s12 = scalar_lea.sflag [#allocation4], %s417_s11 }
 0x248   : > { %p547_p0 = pnand %p997_p10, %p996_p8 }
 0x24a   : > { %p548_p2 = pneg %p547_p0 }
 0x24c   : > { %722 = dma.done.wait (%p548_p2), %s418_s12, 128  }
 0x24d   : > { %724 = vsyncadd (%p548_p2), %s418_s12, 4294967168  ;;  %s22_s23 = sadd.s32 1, %s747_s23   ;;  %s998_s17 = sld [smem:[#allocation11_spill]] }
 0x24e   : > { %p19_p3 = scmp.ge.s32.totalorder %s22_s23, 4   ;;  %s999_s18 = smov %s731_s19 }
 0x24f   : > { %s1000_s19 = smov %s735_s20  ;;  %s1001_s20 = smov %s882_s7 }
 0x250   : > { %s1002_s21 = smov %s743_s22  ;;  %21 = sbr.rel (!%p19_p3) target bundleno = 9 (0x9), region = 89 }
 0x253   : > { %s1003_s22 = smov %s998_s17 }
 0x255   :  { %423 = vsyncpa [#allocation3], 1 }
 0x256   :  { %425 = vsyncpa [#allocation3 + $0x1], 1 }
 0x257   :  { %426 = vsyncpa [#allocation6], 1 }
 0x258   :  { %427 = vsyncpa [#allocation4], 1 }
 0x259   :  { %429 = vsyncpa [#allocation4 + $0x1], 1 }

</bundles_post_ra>
